<compile_context>
chip_gen: v7x
topology: tpu7x:2x2x1
jax: 0.10.0
libtpu: 0.0.40
codegen_flags: <defaults>
</compile_context>

<pallas_src>
import jax
import jax.numpy as jnp
from jax.experimental import pallas as pl
from jax.experimental.pallas import tpu as pltpu


# Packed-parameter layout inside the (8, 19) buffer (PyTorch [out, in] convention):
#   [:,  0: 4] -> W1 (8, 4)      [:,  4: 5] -> b1 (8, 1)
#   [0:4, 5:13] -> W2 (4, 8)     [0:4,13:14] -> b2 (4, 1)
#   [0:1,14:18] -> W3 (1, 4)     [0:1,18:19] -> b3 (1, 1)
_PCOLS = 19


def mlp_kernel(p_ref, x_ref, o_ref):
    p = p_ref[...]                      # (8, 19) packed params (VMEM-resident)
    x = x_ref[...]                      # (4, TB), batch on lanes

    w1 = p[:, 0:4]                      # (8, 4)
    b1 = p[:, 4:5]                      # (8, 1)
    w2 = p[0:4, 5:13]                   # (4, 8)
    b2 = p[0:4, 13:14]                  # (4, 1)
    w3 = p[0:1, 14:18]                  # (1, 4)
    b3 = p[0:1, 18:19]                  # (1, 1)

    # fc1 + ReLU: h1[o, b] = relu(sum_i W1[o, i] * x[i, b] + b1[o])
    h1 = b1 + w1[:, 0:1] * x[0:1, :]
    for i in range(1, 4):
        h1 = h1 + w1[:, i:i + 1] * x[i:i + 1, :]
    h1 = jnp.maximum(h1, 0.0)           # (8, TB)

    # fc2 + ReLU
    h2 = b2 + w2[:, 0:1] * h1[0:1, :]
    for i in range(1, 8):
        h2 = h2 + w2[:, i:i + 1] * h1[i:i + 1, :]
    h2 = jnp.maximum(h2, 0.0)           # (4, TB)

    # fc3 (no activation)
    y = b3 + w3[:, 0:1] * h2[0:1, :]
    for i in range(1, 4):
        y = y + w3[:, i:i + 1] * h2[i:i + 1, :]

    o_ref[...] = y.astype(o_ref.dtype)  # (1, TB), lane-dense store


def _round_up(n, m):
    return ((n + m - 1) // m) * m


def pack_params(params):
    """Pack the six Linear weights/biases into one (8, 19) f32 buffer."""
    w1, b1, w2, b2, w3, b3 = params     # PyTorch convention: W is [out, in]
    p = jnp.zeros((8, _PCOLS), jnp.float32)
    p = p.at[:, 0:4].set(w1)
    p = p.at[:, 4].set(b1)
    p = p.at[0:4, 5:13].set(w2)
    p = p.at[0:4, 13].set(b2)
    p = p.at[0:1, 14:18].set(w3)
    p = p.at[0, 18].set(b3[0])
    return p


def cliente_satisfacao_forward(x, params):
    """x: [batch, 4] float32 (PyTorch layout). Returns [batch, 1] float32."""
    batch = x.shape[0]
    packed = pack_params(params)

    # Lane-dense batch tile: multiple of 128, capped at 1024 (mem-bound sweet spot).
    tb = min(1024, _round_up(batch, 128))
    b_pad = _round_up(batch, tb)

    # Transpose to feature-on-sublane / batch-on-lane layout and zero-pad batch.
    xt = jnp.zeros((4, b_pad), jnp.float32).at[:, :batch].set(x.astype(jnp.float32).T)

    out_t = pl.pallas_call(
        mlp_kernel,
        out_shape=jax.ShapeDtypeStruct((1, b_pad), jnp.float32),
        grid=(b_pad // tb,),
        in_specs=[
            # Packed params: constant block index -> single DMA, stays resident.
            pl.BlockSpec((8, _PCOLS), lambda i: (0, 0)),
            # Activation tile: [4, TB] per grid step.
            pl.BlockSpec((4, tb), lambda i: (0, i)),
        ],
        out_specs=pl.BlockSpec((1, tb), lambda i: (0, i)),
        compiler_params=pltpu.CompilerParams(
            dimension_semantics=("parallel",),
        ),
    )(packed, xt)

    # Back to PyTorch [batch, 1] layout, dropping batch padding.
    return out_t[:, :batch].T


def init_params(key):
    # Deterministic init mimicking nn.Linear default: uniform +/- 1/sqrt(fan_in),
    # stored in PyTorch convention W: [out, in], b: [out].
    def linear(k, fan_in, fan_out):
        kw, kb = jax.random.split(k)
        bound = 1.0 / jnp.sqrt(fan_in)
        w = jax.random.uniform(kw, (fan_out, fan_in), jnp.float32, -bound, bound)
        b = jax.random.uniform(kb, (fan_out,), jnp.float32, -bound, bound)
        return w, b

    k1, k2, k3 = jax.random.split(key, 3)
    w1, b1 = linear(k1, 4, 8)
    w2, b2 = linear(k2, 8, 4)
    w3, b3 = linear(k3, 4, 1)
    return (w1, b1, w2, b2, w3, b3)


def reference_forward(x, params):
    w1, b1, w2, b2, w3, b3 = params
    h1 = jnp.maximum(x @ w1.T + b1, 0.0)
    h2 = jnp.maximum(h1 @ w2.T + b2, 0.0)
    return h2 @ w3.T + b3


if __name__ == "__main__":
    key = jax.random.PRNGKey(0)
    kx, kx2, kp = jax.random.split(key, 3)
    params = init_params(kp)

    # Small canonical check (batch=8).
    batch = 8
    x = jax.random.normal(kx, (batch, 4), jnp.float32)
    out = jax.block_until_ready(cliente_satisfacao_forward(x, params))
    ref = reference_forward(x, params)
    assert out.shape == (batch, 1), out.shape
    assert jnp.allclose(out, ref, atol=1e-5, rtol=1e-5), (out, ref)

    # Non-multiple-of-128 batch exercises padding + multi-step grid path.
    batch2 = 300
    x2 = jax.random.normal(kx2, (batch2, 4), jnp.float32)
    out2 = jax.block_until_ready(cliente_satisfacao_forward(x2, params))
    ref2 = reference_forward(x2, params)
    assert out2.shape == (batch2, 1), out2.shape
    assert jnp.allclose(out2, ref2, atol=1e-5, rtol=1e-5)

    print("KERNEL_OK")
</pallas_src>

<mosaic_0001>
module attributes {stable_mosaic.version = 11 : i64} {
  func.func @mlp_kernel(%arg0: i32, %arg1: memref<8x19xf32, #tpu.memory_space<vmem>>, %arg2: memref<4x128xf32, #tpu.memory_space<vmem>>, %arg3: memref<1x128xf32, #tpu.memory_space<vmem>>) attributes {dimension_semantics = [#tpu.dimension_semantics<parallel>], iteration_bounds = array<i64: 1>, scalar_prefetch = 0 : i64, scratch_operands = 0 : i64, tpu.core_type = #tpu.core_type<tc>, window_params = [{pipeline_mode = #tpu.pipeline_mode<synchronous>, transform_indices = @transform_0, window_bounds = array<i64: 8, 19>}, {transform_indices = @transform_1, window_bounds = array<i64: 4, 128>}, {transform_indices = @transform_2, window_bounds = array<i64: 1, 128>}]} {
    %c0 = arith.constant 0 : index
    %c0_0 = arith.constant 0 : index
    %0 = vector.load %arg1[%c0, %c0_0] : memref<8x19xf32, #tpu.memory_space<vmem>>, vector<8x19xf32>
    %c0_1 = arith.constant 0 : index
    %c0_2 = arith.constant 0 : index
    %1 = vector.load %arg2[%c0_1, %c0_2] : memref<4x128xf32, #tpu.memory_space<vmem>>, vector<4x128xf32>
    %2 = vector.extract_strided_slice %0 {offsets = [0, 0], sizes = [8, 4], strides = [1, 1]} : vector<8x19xf32> to vector<8x4xf32>
    %3 = vector.extract_strided_slice %0 {offsets = [0, 4], sizes = [8, 1], strides = [1, 1]} : vector<8x19xf32> to vector<8x1xf32>
    %4 = vector.extract_strided_slice %0 {offsets = [0, 5], sizes = [4, 8], strides = [1, 1]} : vector<8x19xf32> to vector<4x8xf32>
    %5 = vector.extract_strided_slice %0 {offsets = [0, 13], sizes = [4, 1], strides = [1, 1]} : vector<8x19xf32> to vector<4x1xf32>
    %6 = vector.extract_strided_slice %0 {offsets = [0, 14], sizes = [1, 4], strides = [1, 1]} : vector<8x19xf32> to vector<1x4xf32>
    %7 = vector.extract_strided_slice %0 {offsets = [0, 18], sizes = [1, 1], strides = [1, 1]} : vector<8x19xf32> to vector<1x1xf32>
    %8 = vector.extract_strided_slice %2 {offsets = [0, 0], sizes = [8, 1], strides = [1, 1]} : vector<8x4xf32> to vector<8x1xf32>
    %9 = vector.extract_strided_slice %1 {offsets = [0, 0], sizes = [1, 128], strides = [1, 1]} : vector<4x128xf32> to vector<1x128xf32>
    %10 = vector.broadcast %8 : vector<8x1xf32> to vector<8x128xf32>
    %11 = vector.broadcast %9 : vector<1x128xf32> to vector<8x128xf32>
    %12 = arith.mulf %10, %11 : vector<8x128xf32>
    %13 = vector.broadcast %3 : vector<8x1xf32> to vector<8x128xf32>
    %14 = arith.addf %13, %12 : vector<8x128xf32>
    %15 = vector.extract_strided_slice %2 {offsets = [0, 1], sizes = [8, 1], strides = [1, 1]} : vector<8x4xf32> to vector<8x1xf32>
    %16 = vector.extract_strided_slice %1 {offsets = [1, 0], sizes = [1, 128], strides = [1, 1]} : vector<4x128xf32> to vector<1x128xf32>
    %17 = vector.broadcast %15 : vector<8x1xf32> to vector<8x128xf32>
    %18 = vector.broadcast %16 : vector<1x128xf32> to vector<8x128xf32>
    %19 = arith.mulf %17, %18 : vector<8x128xf32>
    %20 = arith.addf %14, %19 : vector<8x128xf32>
    %21 = vector.extract_strided_slice %2 {offsets = [0, 2], sizes = [8, 1], strides = [1, 1]} : vector<8x4xf32> to vector<8x1xf32>
    %22 = vector.extract_strided_slice %1 {offsets = [2, 0], sizes = [1, 128], strides = [1, 1]} : vector<4x128xf32> to vector<1x128xf32>
    %23 = vector.broadcast %21 : vector<8x1xf32> to vector<8x128xf32>
    %24 = vector.broadcast %22 : vector<1x128xf32> to vector<8x128xf32>
    %25 = arith.mulf %23, %24 : vector<8x128xf32>
    %26 = arith.addf %20, %25 : vector<8x128xf32>
    %27 = vector.extract_strided_slice %2 {offsets = [0, 3], sizes = [8, 1], strides = [1, 1]} : vector<8x4xf32> to vector<8x1xf32>
    %28 = vector.extract_strided_slice %1 {offsets = [3, 0], sizes = [1, 128], strides = [1, 1]} : vector<4x128xf32> to vector<1x128xf32>
    %29 = vector.broadcast %27 : vector<8x1xf32> to vector<8x128xf32>
    %30 = vector.broadcast %28 : vector<1x128xf32> to vector<8x128xf32>
    %31 = arith.mulf %29, %30 : vector<8x128xf32>
    %32 = arith.addf %26, %31 : vector<8x128xf32>
    %cst = arith.constant 0.000000e+00 : f32
    %33 = vector.broadcast %cst : f32 to vector<8x128xf32>
    %34 = arith.maximumf %32, %33 : vector<8x128xf32>
    %35 = vector.extract_strided_slice %4 {offsets = [0, 0], sizes = [4, 1], strides = [1, 1]} : vector<4x8xf32> to vector<4x1xf32>
    %36 = vector.extract_strided_slice %34 {offsets = [0, 0], sizes = [1, 128], strides = [1, 1]} : vector<8x128xf32> to vector<1x128xf32>
    %37 = vector.broadcast %35 : vector<4x1xf32> to vector<4x128xf32>
    %38 = vector.broadcast %36 : vector<1x128xf32> to vector<4x128xf32>
    %39 = arith.mulf %37, %38 : vector<4x128xf32>
    %40 = vector.broadcast %5 : vector<4x1xf32> to vector<4x128xf32>
    %41 = arith.addf %40, %39 : vector<4x128xf32>
    %42 = vector.extract_strided_slice %4 {offsets = [0, 1], sizes = [4, 1], strides = [1, 1]} : vector<4x8xf32> to vector<4x1xf32>
    %43 = vector.extract_strided_slice %34 {offsets = [1, 0], sizes = [1, 128], strides = [1, 1]} : vector<8x128xf32> to vector<1x128xf32>
    %44 = vector.broadcast %42 : vector<4x1xf32> to vector<4x128xf32>
    %45 = vector.broadcast %43 : vector<1x128xf32> to vector<4x128xf32>
    %46 = arith.mulf %44, %45 : vector<4x128xf32>
    %47 = arith.addf %41, %46 : vector<4x128xf32>
    %48 = vector.extract_strided_slice %4 {offsets = [0, 2], sizes = [4, 1], strides = [1, 1]} : vector<4x8xf32> to vector<4x1xf32>
    %49 = vector.extract_strided_slice %34 {offsets = [2, 0], sizes = [1, 128], strides = [1, 1]} : vector<8x128xf32> to vector<1x128xf32>
    %50 = vector.broadcast %48 : vector<4x1xf32> to vector<4x128xf32>
    %51 = vector.broadcast %49 : vector<1x128xf32> to vector<4x128xf32>
    %52 = arith.mulf %50, %51 : vector<4x128xf32>
    %53 = arith.addf %47, %52 : vector<4x128xf32>
    %54 = vector.extract_strided_slice %4 {offsets = [0, 3], sizes = [4, 1], strides = [1, 1]} : vector<4x8xf32> to vector<4x1xf32>
    %55 = vector.extract_strided_slice %34 {offsets = [3, 0], sizes = [1, 128], strides = [1, 1]} : vector<8x128xf32> to vector<1x128xf32>
    %56 = vector.broadcast %54 : vector<4x1xf32> to vector<4x128xf32>
    %57 = vector.broadcast %55 : vector<1x128xf32> to vector<4x128xf32>
    %58 = arith.mulf %56, %57 : vector<4x128xf32>
    %59 = arith.addf %53, %58 : vector<4x128xf32>
    %60 = vector.extract_strided_slice %4 {offsets = [0, 4], sizes = [4, 1], strides = [1, 1]} : vector<4x8xf32> to vector<4x1xf32>
    %61 = vector.extract_strided_slice %34 {offsets = [4, 0], sizes = [1, 128], strides = [1, 1]} : vector<8x128xf32> to vector<1x128xf32>
    %62 = vector.broadcast %60 : vector<4x1xf32> to vector<4x128xf32>
    %63 = vector.broadcast %61 : vector<1x128xf32> to vector<4x128xf32>
    %64 = arith.mulf %62, %63 : vector<4x128xf32>
    %65 = arith.addf %59, %64 : vector<4x128xf32>
    %66 = vector.extract_strided_slice %4 {offsets = [0, 5], sizes = [4, 1], strides = [1, 1]} : vector<4x8xf32> to vector<4x1xf32>
    %67 = vector.extract_strided_slice %34 {offsets = [5, 0], sizes = [1, 128], strides = [1, 1]} : vector<8x128xf32> to vector<1x128xf32>
    %68 = vector.broadcast %66 : vector<4x1xf32> to vector<4x128xf32>
    %69 = vector.broadcast %67 : vector<1x128xf32> to vector<4x128xf32>
    %70 = arith.mulf %68, %69 : vector<4x128xf32>
    %71 = arith.addf %65, %70 : vector<4x128xf32>
    %72 = vector.extract_strided_slice %4 {offsets = [0, 6], sizes = [4, 1], strides = [1, 1]} : vector<4x8xf32> to vector<4x1xf32>
    %73 = vector.extract_strided_slice %34 {offsets = [6, 0], sizes = [1, 128], strides = [1, 1]} : vector<8x128xf32> to vector<1x128xf32>
    %74 = vector.broadcast %72 : vector<4x1xf32> to vector<4x128xf32>
    %75 = vector.broadcast %73 : vector<1x128xf32> to vector<4x128xf32>
    %76 = arith.mulf %74, %75 : vector<4x128xf32>
    %77 = arith.addf %71, %76 : vector<4x128xf32>
    %78 = vector.extract_strided_slice %4 {offsets = [0, 7], sizes = [4, 1], strides = [1, 1]} : vector<4x8xf32> to vector<4x1xf32>
    %79 = vector.extract_strided_slice %34 {offsets = [7, 0], sizes = [1, 128], strides = [1, 1]} : vector<8x128xf32> to vector<1x128xf32>
    %80 = vector.broadcast %78 : vector<4x1xf32> to vector<4x128xf32>
    %81 = vector.broadcast %79 : vector<1x128xf32> to vector<4x128xf32>
    %82 = arith.mulf %80, %81 : vector<4x128xf32>
    %83 = arith.addf %77, %82 : vector<4x128xf32>
    %cst_3 = arith.constant 0.000000e+00 : f32
    %84 = vector.broadcast %cst_3 : f32 to vector<4x128xf32>
    %85 = arith.maximumf %83, %84 : vector<4x128xf32>
    %86 = vector.extract_strided_slice %6 {offsets = [0, 0], sizes = [1, 1], strides = [1, 1]} : vector<1x4xf32> to vector<1x1xf32>
    %87 = vector.extract_strided_slice %85 {offsets = [0, 0], sizes = [1, 128], strides = [1, 1]} : vector<4x128xf32> to vector<1x128xf32>
    %88 = vector.broadcast %86 : vector<1x1xf32> to vector<1x128xf32>
    %89 = arith.mulf %88, %87 : vector<1x128xf32>
    %90 = vector.broadcast %7 : vector<1x1xf32> to vector<1x128xf32>
    %91 = arith.addf %90, %89 : vector<1x128xf32>
    %92 = vector.extract_strided_slice %6 {offsets = [0, 1], sizes = [1, 1], strides = [1, 1]} : vector<1x4xf32> to vector<1x1xf32>
    %93 = vector.extract_strided_slice %85 {offsets = [1, 0], sizes = [1, 128], strides = [1, 1]} : vector<4x128xf32> to vector<1x128xf32>
    %94 = vector.broadcast %92 : vector<1x1xf32> to vector<1x128xf32>
    %95 = arith.mulf %94, %93 : vector<1x128xf32>
    %96 = arith.addf %91, %95 : vector<1x128xf32>
    %97 = vector.extract_strided_slice %6 {offsets = [0, 2], sizes = [1, 1], strides = [1, 1]} : vector<1x4xf32> to vector<1x1xf32>
    %98 = vector.extract_strided_slice %85 {offsets = [2, 0], sizes = [1, 128], strides = [1, 1]} : vector<4x128xf32> to vector<1x128xf32>
    %99 = vector.broadcast %97 : vector<1x1xf32> to vector<1x128xf32>
    %100 = arith.mulf %99, %98 : vector<1x128xf32>
    %101 = arith.addf %96, %100 : vector<1x128xf32>
    %102 = vector.extract_strided_slice %6 {offsets = [0, 3], sizes = [1, 1], strides = [1, 1]} : vector<1x4xf32> to vector<1x1xf32>
    %103 = vector.extract_strided_slice %85 {offsets = [3, 0], sizes = [1, 128], strides = [1, 1]} : vector<4x128xf32> to vector<1x128xf32>
    %104 = vector.broadcast %102 : vector<1x1xf32> to vector<1x128xf32>
    %105 = arith.mulf %104, %103 : vector<1x128xf32>
    %106 = arith.addf %101, %105 : vector<1x128xf32>
    %c0_4 = arith.constant 0 : index
    %c0_5 = arith.constant 0 : index
    %107 = vector.load %arg3[%c0_4, %c0_5] : memref<1x128xf32, #tpu.memory_space<vmem>>, vector<1x128xf32>
    tpu.vector_store %arg3[%c0_4, %c0_5], %106 {strides = array<i32>} : memref<1x128xf32, #tpu.memory_space<vmem>>, vector<1x128xf32>,
    return
  }
  func.func @transform_0(%arg0: i32) -> (i32, i32) {
    %c0_i32 = arith.constant 0 : i32
    %c0_i32_0 = arith.constant 0 : i32
    %c0_i32_1 = arith.constant 0 : i32
    return %c0_i32, %c0_i32_0 : i32, i32
  }
  func.func @transform_1(%arg0: i32) -> (i32, i32) {
    %c0_i32 = arith.constant 0 : i32
    %c0_i32_0 = arith.constant 0 : i32
    return %c0_i32, %arg0 : i32, i32
  }
  func.func @transform_2(%arg0: i32) -> (i32, i32) {
    %c0_i32 = arith.constant 0 : i32
    %c0_i32_0 = arith.constant 0 : i32
    return %c0_i32, %arg0 : i32, i32
  }
}

</mosaic_0001>

<bundles_post_ra>
// kernel: tpu_custom_call.1
= control target key start
LH: loop header
LB: loop body
LE: loop exit
PB: predicated region body
PF: predicated region fallthrough
CT: control target
= control target key end

     0   :  { %7 = vsyncpa [#allocation3], 0  ;;  %s408_s0 = inlined_call_operand.hbm [shape: f32[8,19], index: 0, kind: input, shape index: {}]   ;;  %s409_s1 = inlined_call_operand.hbm [shape: f32[4,128], index: 1, kind: input, shape index: {}]   ;;  %s410_s2 = inlined_call_operand.hbm [shape: f32[1,128], index: 2, kind: output, shape index: {}]  }
   0x1   :  { %8 = vsyncpa [#allocation6], 0 }
   0x2   :  { %9 = vsyncpa [#allocation4], 0  ;;  %s335_s9 = smov [#allocation2]   ;;  %s336_s11 = smov [#allocation5]  }
   0x3   :  { %s16_s10 = sshll.u32 %s335_s9, 4  ;;  %s26_s12 = sshll.u32 %s336_s11, 4  ;;  %s17_s10 = int_to_ptr.vmem [resolvable:$true] %s16_s10  ;;  %s27_s12 = int_to_ptr.vmem [resolvable:$true] %s26_s12 }
   0x4   :  { %s263_s15 = scalar_lea.hbm %s408_s0, 128 }
   0x5   :  { %p264_p0 = scmp.ne.s32.totalorder %s408_s0, %s263_s15  ;;  %p267_p1 = scmp.lt.u32.totalorder %s263_s15, %s408_s0 }
   0x7   :  { %p269_p2 = pnand %p267_p1, %p264_p0 }
   0x9   :  { %272 = shalt.err (!%p269_p2)
}
   0xa   :  { %s273_s20 = scalar_lea.vmem %s17_s10, 128  ;;  %p278_p4 = scmp.lt.s32.totalorder %s17_s10, %s17_s10 }
   0xb   :  { %p274_p3 = scmp.ne.s32.totalorder %s17_s10, %s273_s20  ;;  %p279_p5 = scmp.lt.s32.totalorder %s273_s20, %s273_s20 }
   0xd   :  { %p280_p6 = por %p279_p5, %p278_p4 }
   0xf   :  { %p281_p7 = pnand %p280_p6, %p274_p3 }
  0x11   :  { %284 = shalt.err (!%p281_p7)
}
  0x12   :  { %19 = dma.hbm_to_vmem [thread:$0]  %s408_s0, 128, %s17_s10, [#allocation3]  }
  0x13   :  { %s285_s25 = scalar_lea.hbm %s409_s1, 64 }
  0x14   :  { %p286_p8 = scmp.ne.s32.totalorder %s409_s1, %s285_s25  ;;  %p289_p9 = scmp.lt.u32.totalorder %s285_s25, %s409_s1 }
  0x16   :  { %p291_p10 = pnand %p289_p9, %p286_p8 }
  0x18   :  { %294 = shalt.err (!%p291_p10)
}
  0x19   :  { %s295_s30 = scalar_lea.vmem %s27_s12, 64  ;;  %p300_p12 = scmp.lt.s32.totalorder %s27_s12, %s27_s12 }
  0x1a   :  { %p296_p11 = scmp.ne.s32.totalorder %s27_s12, %s295_s30  ;;  %p301_p13 = scmp.lt.s32.totalorder %s295_s30, %s295_s30 }
  0x1c   :  { %p302_p0 = por %p301_p13, %p300_p12 }
  0x1e   :  { %p303_p1 = pnand %p302_p0, %p296_p11 }
  0x20   :  { %306 = shalt.err (!%p303_p1)
}
  0x21   :  { %29 = dma.hbm_to_vmem [thread:$0]  %s409_s1, 64, %s27_s12, [#allocation6]  }
  0x22   :  { %329 = dma.done.wait [#allocation3], 128  }
  0x23   :  { %330 = vsyncadd [#allocation3], 4294967168 }
  0x24   :  { %331 = dma.done.wait [#allocation6], 64  }
  0x25   :  { %332 = vsyncadd [#allocation6], 4294967232  ;;  %v337_v0 = vmov 1   ;;  %v338_v1 = vmov 0   ;;  %v36_v2 = vld [vmem:[#allocation2] sm:$0xff]  ;;  %v339_v3 = vmov 2   ;;  %v43_v20 = vlaneseq }
  0x26   :  { %245 = vset.pattern.permute.xlu1 %v337_v0  ;;  %243 = vset.pattern.permute.xlu0 %v338_v1  ;;  %v340_v4 = vmov 4   ;;  %v341_v5 = vmov 3   ;;  %v342_v6 = vmov 5   ;;  %v343_v7 = vmov 13   ;;  %v37_v23 = vld [vmem:[#allocation5] sm:$0xf] }
  0x27   :  { %54 = vperm.xlu1 %245, %v36_v2   ;;  %40 = vperm.xlu0 %243, %v36_v2   ;;  %v344_v8 = vmov 7   ;;  %v345_v9 = vmov 6   ;;  %v346_v10 = vmov 10   ;;  %v347_v11 = vmov 8   ;;  %s356_s1 = smov [#allocation7]  }
  0x28   :  { %v348_v12 = vmov 14   ;;  %v349_v13 = vmov 9   ;;  %v350_v14 = vmov 16   ;;  %v351_v15 = vmov 11   ;;  %s211_s4 = sshll.u32 %s356_s1, 4  ;;  %s212_s4 = int_to_ptr.vmem [resolvable:$true] %s211_s4 }
  0x29   :  { %v352_v16 = vmov 17   ;;  %v353_v17 = vmov 12   ;;  %v354_v18 = vmov 18   ;;  %v355_v19 = vmov 15   ;;  %s307_s5 = scalar_lea.vmem %s212_s4, 16  ;;  %s311_s6 = scalar_lea.vmem %s212_s4, 32 }
  0x2a   :  { %v44_v21 = vshrl.u32 %v43_v20, 7  ;;  %p308_p2 = scmp.ne.s32.totalorder %s212_s4, %s307_s5  ;;  %p312_p3 = scmp.lt.s32.totalorder %s212_s4, %s212_s4 }
  0x2b   :  { %246 = vset.pattern.permute.xlu1 %v339_v3  ;;  %244 = vset.pattern.permute.xlu0 %v340_v4  ;;  %p313_p4 = scmp.lt.s32.totalorder %s311_s6, %s307_s5 }
  0x2c   :  { %64 = vperm.xlu1 %246, %v36_v2   ;;  %49 = vperm.xlu0 %244, %v36_v2   ;;  %v45_v22 = vsub.s32 0, %v44_v21  ;;  %v59_v24 = vsub.s32 1, %v44_v21  ;;  %v69_v28 = vsub.s32 2, %v44_v21  ;;  %v79_v31 = vsub.s32 3, %v44_v21 }
  0x2d   :  { %v134_v59 = vsub.s32 4, %v44_v21  ;;  %v144_v62 = vsub.s32 5, %v44_v21  ;;  %v154_v3 = vsub.s32 6, %v44_v21  ;;  %p314_p5 = por %p313_p4, %p312_p3 }
  0x2e   :  { %v46_v25 = vrot.slane %v37_v23, %v45_v22  ;;  %v60_v29 = vrot.slane %v37_v23, %v59_v24  ;;  %v70_v32 = vrot.slane %v37_v23, %v69_v28  ;;  %v80_v37 = vrot.slane %v37_v23, %v79_v31 }
  0x2f   :  { %p315_p6 = pnand %p314_p5, %p308_p2 }
  0x30   :  { %247 = vset.pattern.permute.xlu1 %v341_v5  ;;  %248 = vset.pattern.permute.xlu0 %v342_v6 }
  0x31   :  { %74 = vperm.xlu1 %247, %v36_v2   ;;  %85 = vperm.xlu0 %248, %v36_v2  }
  0x35   :  { %249 = vset.pattern.permute.xlu1 %v343_v7  ;;  %251 = vset.pattern.permute.xlu0 %v344_v8 }
  0x36   :  { %94 = vperm.xlu1 %249, %v36_v2   ;;  %109 = vperm.xlu0 %251, %v36_v2  }
  0x3a   :  { %250 = vset.pattern.permute.xlu1 %v345_v9  ;;  %254 = vset.pattern.permute.xlu0 %v346_v10  ;;  %v164_v10 = vsub.s32 7, %v44_v21 }
  0x3b   :  { %99 = vperm.xlu1 %250, %v36_v2   ;;  %139 = vperm.xlu0 %254, %v36_v2  }
  0x3f   :  { %252 = vset.pattern.permute.xlu1 %v347_v11  ;;  %257 = vset.pattern.permute.xlu0 %v348_v12 }
  0x40   :  { %119 = vperm.xlu1 %252, %v36_v2   ;;  %170 = vperm.xlu0 %257, %v36_v2  }
  0x44   :  { %253 = vset.pattern.permute.xlu1 %v349_v13  ;;  %260 = vset.pattern.permute.xlu0 %v350_v14 }
  0x45   :  { %129 = vperm.xlu1 %253, %v36_v2   ;;  %189 = vperm.xlu0 %260, %v36_v2  }
  0x49   :  { %255 = vset.pattern.permute.xlu1 %v351_v15  ;;  %262 = vset.pattern.permute.xlu0 %v352_v16 }
  0x4a   :  { %149 = vperm.xlu1 %255, %v36_v2  }
  0x4e   :  { %256 = vset.pattern.permute.xlu1 %v353_v17 }
  0x4f   :  { %159 = vperm.xlu1 %256, %v36_v2  }
  0x53   :  { %258 = vset.pattern.permute.xlu1 %v354_v18 }
  0x54   :  { %175 = vperm.xlu1 %258, %v36_v2  }
  0x58   :  { %259 = vset.pattern.permute.xlu1 %v355_v19 }
  0x59   :  { %180 = vperm.xlu1 %259, %v36_v2  }
  0x5d   :  { %261 = vset.pattern.permute.xlu1 %v352_v16 }
  0x5e   :  { %197 = vperm.xlu1 %261, %v36_v2  }
  0xa6   :  { %v55_v26 = vpop.permute.xlu1 %54  ;;  %v41_v27 = vpop.permute.xlu0 %40 }
  0xa7   :  { %v47_v30 = vmul.f32 %v46_v25, %v41_v27  ;;  %v61_v35 = vmul.f32 %v60_v29, %v55_v26 }
  0xab   :  { %v65_v33 = vpop.permute.xlu1 %64  ;;  %v50_v34 = vpop.permute.xlu0 %49 }
  0xac   :  { %v52_v36 = vadd.f32 %v50_v34, %v47_v30  ;;  %v71_v38 = vmul.f32 %v70_v32, %v65_v33 }
  0xae   :  { %v62_v39 = vadd.f32 %v61_v35, %v52_v36 }
  0xb0   :  { %v75_v40 = vpop.permute.xlu1 %74  ;;  %v72_v41 = vadd.f32 %v71_v38, %v62_v39  ;;  %v86_v47 = vpop.permute.xlu0 %85 }
  0xb1   :  { %v81_v42 = vmul.f32 %v80_v37, %v75_v40 }
  0xb3   :  { %v82_v43 = vadd.f32 %v81_v42, %v72_v41 }
  0xb5   :  { %v83_v44 = vmax.f32 %v82_v43, 0.0  ;;  %v95_v45 = vpop.permute.xlu1 %94  ;;  %v110_v55 = vpop.permute.xlu0 %109 }
  0xb7   :  { %v91_v46 = vrot.slane %v83_v44, %v45_v22  ;;  %v105_v49 = vrot.slane %v83_v44, %v59_v24  ;;  %v115_v52 = vrot.slane %v83_v44, %v69_v28  ;;  %v125_v58 = vrot.slane %v83_v44, %v79_v31 }
  0xb8   :  { %v135_v63 = vrot.slane %v83_v44, %v134_v59  ;;  %v145_v5 = vrot.slane %v83_v44, %v144_v62  ;;  %v155_v9 = vrot.slane %v83_v44, %v154_v3  ;;  %v165_v13 = vrot.slane %v83_v44, %v164_v10 }
  0xb9   :  { %v92_v48 = vmul.f32 %v91_v46, %v86_v47  ;;  %v116_v56 = vmul.f32 %v115_v52, %v110_v55 }
  0xba   :  { %v100_v50 = vpop.permute.xlu1 %99  ;;  %v140_v4 = vpop.permute.xlu0 %139 }
  0xbb   :  { %v97_v51 = vadd.f32 %v95_v45, %v92_v48  ;;  %v106_v53 = vmul.f32 %v105_v49, %v100_v50  ;;  %v146_v7 = vmul.f32 %v145_v5, %v140_v4 }
  0xbd   :  { %v107_v54 = vadd.f32 %v106_v53, %v97_v51 }
  0xbf   :  { %v120_v57 = vpop.permute.xlu1 %119  ;;  %v117_v60 = vadd.f32 %v116_v56, %v107_v54  ;;  %v171_v18 = vpop.permute.xlu0 %170 }
  0xc0   :  { %v126_v61 = vmul.f32 %v125_v58, %v120_v57 }
  0xc2   :  { %v127_v1 = vadd.f32 %v126_v61, %v117_v60 }
  0xc4   :  { %v130_v0 = vpop.permute.xlu1 %129  ;;  %v190_v25 = vpop.permute.xlu0 %189 }
  0xc5   :  { %v136_v2 = vmul.f32 %v135_v63, %v130_v0 }
  0xc7   :  { %v137_v6 = vadd.f32 %v136_v2, %v127_v1 }
  0xc9   :  { %v150_v8 = vpop.permute.xlu1 %149  ;;  %v147_v11 = vadd.f32 %v146_v7, %v137_v6 }
  0xca   :  { %v156_v12 = vmul.f32 %v155_v9, %v150_v8 }
  0xcc   :  { %v157_v15 = vadd.f32 %v156_v12, %v147_v11 }
  0xce   :  { %v160_v14 = vpop.permute.xlu1 %159 }
  0xcf   :  { %v166_v16 = vmul.f32 %v165_v13, %v160_v14 }
  0xd1   :  { %v167_v17 = vadd.f32 %v166_v16, %v157_v15 }
  0xd3   :  { %v168_v19 = vmax.f32 %v167_v17, 0.0  ;;  %v176_v20 = vpop.permute.xlu1 %175 }
  0xd5   :  { %v173_v22 = vmul.f32 %v171_v18, %v168_v19  ;;  %v192_v23 = vrot.slane %v168_v19, 2  ;;  %v184_v24 = vrot.slane %v168_v19, 1  ;;  %v200_v21 = vrot.slane %v168_v19, 3 }
  0xd7   :  { %v178_v27 = vadd.f32 %v176_v20, %v173_v22  ;;  %v194_v29 = vmul.f32 %v192_v23, %v190_v25 }
  0xd8   :  { %v181_v26 = vpop.permute.xlu1 %180 }
  0xd9   :  { %v186_v28 = vmul.f32 %v184_v24, %v181_v26 }
  0xdb   :  { %v187_v30 = vadd.f32 %v186_v28, %v178_v27 }
  0xdd   :  { %v198_v31 = vpop.permute.xlu1 %197  ;;  %v195_v32 = vadd.f32 %v194_v29, %v187_v30 }
  0xde   :  { %v202_v33 = vmul.f32 %v200_v21, %v198_v31 }
  0xe0   :  { %v203_v34 = vadd.f32 %v202_v33, %v195_v32 }
  0xe2   :  { %204 = vst [vmem:[#allocation7] sm:$0x1] %v203_v34 }
  0xe3   :  { %318 = shalt.err (!%p315_p6)
}
  0xe4   :  { %s319_s9 = scalar_lea.hbm %s410_s2, 16 }
  0xe5   :  { %p320_p7 = scmp.ne.s32.totalorder %s410_s2, %s319_s9  ;;  %p323_p8 = scmp.lt.u32.totalorder %s319_s9, %s410_s2 }
  0xe7   :  { %p325_p9 = pnand %p323_p8, %p320_p7 }
  0xe9   :  { %328 = shalt.err (!%p325_p9)
}
  0xea   :  { %214 = dma.vmem_to_hbm [thread:$0]  %s212_s4, 16, %s410_s2, [#allocation4]  }
  0xeb   :  { %333 = dma.done.wait [#allocation4], 16  }
  0xec   :  { %334 = vsyncadd [#allocation4], 4294967280 }
  0xed   :  { %218 = vsyncpa [#allocation3], 1 }
  0xee   :  { %219 = vsyncpa [#allocation6], 1 }
  0xef   :  { %220 = vsyncpa [#allocation4], 1 }

</bundles_post_ra>
